<compile_context>
chip_gen: v7x
topology: tpu7x:2x2x1
jax: 0.10.0
libtpu: 0.0.40
codegen_flags: <defaults>
</compile_context>

<pallas_src>
import functools

import jax
import jax.numpy as jnp
from jax import lax
from jax.experimental import pallas as pl
from jax.experimental.pallas import tpu as pltpu

LANE = 128
_TARGET_BLOCK_BYTES = 2 * 1024 * 1024   # per-input, per-pipeline-buffer block


def _round_down(a, b):
    return (a // b) * b


def _charbonnier_kernel(x_ref, y_ref, out_ref, *, eps, full_rows, rem_lanes,
                        tile_m, tiles_per_split, masked):
    """Accumulate folded sqrt((x-y)^2 + eps) partials into out_ref."""
    s = pl.program_id(0)          # parallel split
    t = pl.program_id(1)          # reduction step within the split

    x = x_ref[...].astype(jnp.float32)
    y = y_ref[...].astype(jnp.float32)
    d = x - y

    if masked:
        # Static-emitted only when the grid covers more elements than n.
        g_row0 = (s * tiles_per_split + t) * tile_m
        row = lax.broadcasted_iota(jnp.int32, (tile_m, LANE), 0) + g_row0
        if rem_lanes:
            lane = lax.broadcasted_iota(jnp.int32, (tile_m, LANE), 1)
            mask = (row < full_rows) | ((row == full_rows) & (lane < rem_lanes))
        else:
            mask = row < full_rows
        d = jnp.where(mask, d, 0.0)                       # kill OOB garbage/NaN
        err = jnp.where(mask, jnp.sqrt(d * d + jnp.float32(eps)), 0.0)
    else:
        err = jnp.sqrt(d * d + jnp.float32(eps))

    # Fold (tile_m, 128) -> (8, 128): layout-preserving reshape + vreg adds.
    folded = err.reshape(tile_m // 8, 8, LANE).sum(axis=0)

    @pl.when(t == 0)
    def _():
        out_ref[...] = folded

    @pl.when(t > 0)
    def _():
        out_ref[...] += folded


def charbonnier_loss(outputs, targets, eps=1e-6):
    """mean(sqrt((outputs - targets)^2 + eps)), matching the PyTorch module."""
    assert outputs.shape == targets.shape
    x = outputs.reshape(-1)
    y = targets.reshape(-1)
    n = x.shape[0]

    itemsize = max(jnp.dtype(x.dtype).itemsize, jnp.dtype(y.dtype).itemsize)
    granule = {4: 8, 2: 16, 1: 32}.get(itemsize, 8)   # sublane packing granule

    # Lane-dense slab.  Padding only for tiny inputs or n % 128 != 0; in the
    # common case the reshape is a free bitcast (no extra HBM traffic).
    rows = max(pl.cdiv(n, LANE), granule)
    pad = rows * LANE - n
    if pad:
        x = jnp.pad(x, (0, pad))
        y = jnp.pad(y, (0, pad))
    x = x.reshape(rows, LANE)
    y = y.reshape(rows, LANE)

    tile_m = max(granule,
                 _round_down(min(rows, _TARGET_BLOCK_BYTES // (LANE * itemsize)),
                             granule))
    total_tiles = pl.cdiv(rows, tile_m)
    nsplit = 2 if (total_tiles >= 2 and total_tiles % 2 == 0) else 1
    tiles_per_split = total_tiles // nsplit

    full_rows, rem_lanes = divmod(n, LANE)
    masked = (total_tiles * tile_m * LANE) != n   # grid covers more than n elems

    kernel = functools.partial(
        _charbonnier_kernel, eps=eps, full_rows=full_rows, rem_lanes=rem_lanes,
        tile_m=tile_m, tiles_per_split=tiles_per_split, masked=masked)

    partials = pl.pallas_call(
        kernel,
        out_shape=jax.ShapeDtypeStruct((nsplit * 8, LANE), jnp.float32),
        grid_spec=pltpu.PrefetchScalarGridSpec(
            num_scalar_prefetch=0,
            grid=(nsplit, tiles_per_split),
            in_specs=[
                pl.BlockSpec((tile_m, LANE),
                             lambda s, t: (s * tiles_per_split + t, 0)),
                pl.BlockSpec((tile_m, LANE),
                             lambda s, t: (s * tiles_per_split + t, 0)),
            ],
            out_specs=pl.BlockSpec((8, LANE), lambda s, t: (s, 0)),
        ),
        compiler_params=pltpu.CompilerParams(
            dimension_semantics=("parallel", "arbitrary"),
        ),
    )(x, y)

    return jnp.sum(partials) / jnp.float32(n)


if __name__ == "__main__":
    key = jax.random.PRNGKey(0)
    k1, k2 = jax.random.split(key)
    # NCHW, small shapes consistent with typical usage of the module.
    outputs = jax.random.normal(k1, (2, 4, 16, 16), dtype=jnp.float32)
    targets = jax.random.normal(k2, (2, 4, 16, 16), dtype=jnp.float32)

    loss = charbonnier_loss(outputs, targets, eps=1e-6)
    loss = jax.block_until_ready(loss)

    # Reference check in plain JAX.
    diff = outputs - targets
    ref = jnp.mean(jnp.sqrt(diff * diff + 1e-6))
    assert jnp.allclose(loss, ref, rtol=1e-5, atol=1e-6), (loss, ref)

    print("KERNEL_OK")
</pallas_src>

<mosaic_0001>
module attributes {stable_mosaic.version = 11 : i64} {
  func.func @_charbonnier_kernel(%arg0: i32, %arg1: i32, %arg2: memref<16x128xf32, #tpu.memory_space<vmem>>, %arg3: memref<16x128xf32, #tpu.memory_space<vmem>>, %arg4: memref<8x128xf32, #tpu.memory_space<vmem>>) attributes {dimension_semantics = [#tpu.dimension_semantics<parallel>, #tpu.dimension_semantics<arbitrary>], iteration_bounds = array<i64: 1, 1>, scalar_prefetch = 0 : i64, scratch_operands = 0 : i64, tpu.core_type = #tpu.core_type<tc>, window_params = [{transform_indices = @transform_0, window_bounds = array<i64: 16, 128>}, {transform_indices = @transform_1, window_bounds = array<i64: 16, 128>}, {transform_indices = @transform_2, window_bounds = array<i64: 8, 128>}]} {
    %c0 = arith.constant 0 : index
    %c0_0 = arith.constant 0 : index
    %0 = vector.load %arg2[%c0, %c0_0] : memref<16x128xf32, #tpu.memory_space<vmem>>, vector<16x128xf32>
    %c0_1 = arith.constant 0 : index
    %c0_2 = arith.constant 0 : index
    %1 = vector.load %arg3[%c0_1, %c0_2] : memref<16x128xf32, #tpu.memory_space<vmem>>, vector<16x128xf32>
    %2 = arith.subf %0, %1 : vector<16x128xf32>
    %3 = arith.mulf %2, %2 : vector<16x128xf32>
    %cst = arith.constant 9.99999997E-7 : f32
    %4 = vector.broadcast %cst : f32 to vector<16x128xf32>
    %5 = arith.addf %3, %4 : vector<16x128xf32>
    %6 = math.sqrt %5 : vector<16x128xf32>
    %7 = vector.shape_cast %6 : vector<16x128xf32> to vector<2x8x128xf32>
    %cst_3 = arith.constant dense<0.000000e+00> : vector<8x128xf32>
    %8 = vector.multi_reduction <add>, %7, %cst_3 [0] : vector<2x8x128xf32> to vector<8x128xf32>
    %c0_i32 = arith.constant 0 : i32
    %9 = arith.cmpi eq, %arg1, %c0_i32 : i32
    %10 = arith.extui %9 : i1 to i32
    %c0_i32_4 = arith.constant 0 : i32
    %11 = arith.cmpi ne, %10, %c0_i32_4 : i32
    scf.if %11 {
      %c0_7 = arith.constant 0 : index
      %c0_8 = arith.constant 0 : index
      %15 = vector.load %arg4[%c0_7, %c0_8] : memref<8x128xf32, #tpu.memory_space<vmem>>, vector<8x128xf32>
      tpu.vector_store %arg4[%c0_7, %c0_8], %8 {strides = array<i32>} : memref<8x128xf32, #tpu.memory_space<vmem>>, vector<8x128xf32>,
    } else {
    }
    %c0_i32_5 = arith.constant 0 : i32
    %12 = arith.cmpi sgt, %arg1, %c0_i32_5 : i32
    %13 = arith.extui %12 : i1 to i32
    %c0_i32_6 = arith.constant 0 : i32
    %14 = arith.cmpi ne, %13, %c0_i32_6 : i32
    scf.if %14 {
      %c0_7 = arith.constant 0 : index
      %c0_8 = arith.constant 0 : index
      %15 = vector.load %arg4[%c0_7, %c0_8] : memref<8x128xf32, #tpu.memory_space<vmem>>, vector<8x128xf32>
      %16 = arith.addf %15, %8 : vector<8x128xf32>
      %c0_9 = arith.constant 0 : index
      %c0_10 = arith.constant 0 : index
      %17 = vector.load %arg4[%c0_9, %c0_10] : memref<8x128xf32, #tpu.memory_space<vmem>>, vector<8x128xf32>
      tpu.vector_store %arg4[%c0_9, %c0_10], %16 {strides = array<i32>} : memref<8x128xf32, #tpu.memory_space<vmem>>, vector<8x128xf32>,
    } else {
    }
    return
  }
  func.func @transform_0(%arg0: i32, %arg1: i32) -> (i32, i32) {
    %c1_i32 = arith.constant 1 : i32
    %0 = arith.muli %arg0, %c1_i32 : i32
    %1 = arith.addi %0, %arg1 : i32
    %c0_i32 = arith.constant 0 : i32
    %c0_i32_0 = arith.constant 0 : i32
    return %1, %c0_i32 : i32, i32
  }
  func.func @transform_1(%arg0: i32, %arg1: i32) -> (i32, i32) {
    %c1_i32 = arith.constant 1 : i32
    %0 = arith.muli %arg0, %c1_i32 : i32
    %1 = arith.addi %0, %arg1 : i32
    %c0_i32 = arith.constant 0 : i32
    %c0_i32_0 = arith.constant 0 : i32
    return %1, %c0_i32 : i32, i32
  }
  func.func @transform_2(%arg0: i32, %arg1: i32) -> (i32, i32) {
    %c0_i32 = arith.constant 0 : i32
    %c0_i32_0 = arith.constant 0 : i32
    return %arg0, %c0_i32 : i32, i32
  }
}

</mosaic_0001>

<bundles_post_ra>
// kernel: tpu_custom_call.1
= control target key start
LH: loop header
LB: loop body
LE: loop exit
PB: predicated region body
PF: predicated region fallthrough
CT: control target
= control target key end

     0   :  { %7 = vsyncpa [#allocation3], 0  ;;  %s242_s0 = inlined_call_operand.hbm [shape: f32[16,128], index: 0, kind: input, shape index: {}]   ;;  %s243_s1 = inlined_call_operand.hbm [shape: f32[16,128], index: 1, kind: input, shape index: {}]   ;;  %s244_s2 = inlined_call_operand.hbm [shape: f32[8,128], index: 2, kind: output, shape index: {}]  }
   0x1   :  { %8 = vsyncpa [#allocation6], 0 }
   0x2   :  { %9 = vsyncpa [#allocation4], 0  ;;  %s186_s9 = smov [#allocation2]   ;;  %s114_s13 = scalar_lea.hbm %s242_s0, 256 }
   0x3   :  { %s19_s10 = sshll.u32 %s186_s9, 4  ;;  %p115_p0 = scmp.ne.s32.totalorder %s242_s0, %s114_s13  ;;  %s20_s10 = int_to_ptr.vmem [resolvable:$true] %s19_s10 }
   0x4   :  { %p118_p1 = scmp.lt.u32.totalorder %s114_s13, %s242_s0 }
   0x6   :  { %p120_p2 = pnand %p118_p1, %p115_p0 }
   0x8   :  { %123 = shalt.err (!%p120_p2)
}
   0x9   :  { %s124_s18 = scalar_lea.vmem %s20_s10, 256  ;;  %p129_p4 = scmp.lt.s32.totalorder %s20_s10, %s20_s10 }
   0xa   :  { %p125_p3 = scmp.ne.s32.totalorder %s20_s10, %s124_s18  ;;  %p130_p5 = scmp.lt.s32.totalorder %s124_s18, %s124_s18 }
   0xc   :  { %p131_p6 = por %p130_p5, %p129_p4 }
   0xe   :  { %p132_p7 = pnand %p131_p6, %p125_p3 }
  0x10   :  { %135 = shalt.err (!%p132_p7)
}
  0x11   :  { %s187_s19 = smov 128   ;;  %s188_s20 = smov 8  }
  0x12   :  { %25 = dma.hbm_to_vmem [thread:$0]  %s242_s0, 256, %s20_s10, [#allocation3], %s187_s19, %s187_s19, %s188_s20  }
  0x13   :  { %s189_s23 = smov [#allocation5]   ;;  %s136_s27 = scalar_lea.hbm %s243_s1, 256 }
  0x14   :  { %s35_s24 = sshll.u32 %s189_s23, 4  ;;  %p137_p8 = scmp.ne.s32.totalorder %s243_s1, %s136_s27  ;;  %s36_s24 = int_to_ptr.vmem [resolvable:$true] %s35_s24 }
  0x15   :  { %p140_p9 = scmp.lt.u32.totalorder %s136_s27, %s243_s1 }
  0x17   :  { %p142_p10 = pnand %p140_p9, %p137_p8 }
  0x19   :  { %145 = shalt.err (!%p142_p10)
}
  0x1a   :  { %s146_s4 = scalar_lea.vmem %s36_s24, 256  ;;  %p151_p12 = scmp.lt.s32.totalorder %s36_s24, %s36_s24 }
  0x1b   :  { %p147_p11 = scmp.ne.s32.totalorder %s36_s24, %s146_s4  ;;  %p152_p13 = scmp.lt.s32.totalorder %s146_s4, %s146_s4 }
  0x1d   :  { %p153_p0 = por %p152_p13, %p151_p12 }
  0x1f   :  { %p154_p1 = pnand %p153_p0, %p147_p11 }
  0x21   :  { %157 = shalt.err (!%p154_p1)
}
  0x22   :  { %41 = dma.hbm_to_vmem [thread:$0]  %s243_s1, 256, %s36_s24, [#allocation6], %s187_s19, %s187_s19, %s188_s20  }
  0x23   :  { %180 = dma.done.wait [#allocation3], 256  }
  0x24   :  { %181 = vsyncadd [#allocation3], 4294967040 }
  0x25   :  { %182 = dma.done.wait [#allocation6], 256  }
  0x26   :  { %183 = vsyncadd [#allocation6], 4294967040  ;;  %v52_v0 = vld [vmem:[#allocation2] sm:$0xff]  ;;  %v53_v1 = vld [vmem:[#allocation2 + $0x8] sm:$0xff]  ;;  %s190_s1 = smov [#allocation7]  }
  0x27   :  { %v54_v2 = vld [vmem:[#allocation5] sm:$0xff]  ;;  %v55_v3 = vld [vmem:[#allocation5 + $0x8] sm:$0xff]  ;;  %s95_s6 = sshll.u32 %s190_s1, 4  ;;  %s96_s6 = int_to_ptr.vmem [resolvable:$true] %s95_s6 }
  0x28   :  { %v56_v4 = vsub.f32 %v52_v0, %v54_v2  ;;  %v57_v5 = vsub.f32 %v53_v1, %v55_v3  ;;  %s158_s7 = scalar_lea.vmem %s96_s6, 128  ;;  %p163_p3 = scmp.lt.s32.totalorder %s96_s6, %s96_s6 }
  0x29   :  { %p159_p2 = scmp.ne.s32.totalorder %s96_s6, %s158_s7  ;;  %p164_p4 = scmp.lt.s32.totalorder %s158_s7, %s158_s7 }
  0x2a   :  { %v58_v6 = vmul.f32 %v56_v4, %v56_v4  ;;  %v59_v7 = vmul.f32 %v57_v5, %v57_v5 }
  0x2b   :  { %p165_p5 = por %p164_p4, %p163_p3 }
  0x2c   :  { %v60_v8 = vadd.f32 1e-06, %v58_v6  ;;  %v61_v9 = vadd.f32 1e-06, %v59_v7 }
  0x2d   :  { %p166_p6 = pnand %p165_p5, %p159_p2 }
  0x2e   :  { %110 = vrsqrt.f32 %v60_v8  ;;  %vm64_vm0 = vcmp.eq.f32.partialorder %v60_v8, inf  ;;  %v67_v11 = vand.u32 2147483648, %v60_v8  ;;  %vm66_vm1 = vcmp.eq.f32.partialorder %v60_v8, 0.0 }
  0x2f   :  { %112 = vrsqrt.f32 %v61_v9  ;;  %vm71_vm2 = vcmp.eq.f32.partialorder %v61_v9, inf  ;;  %v74_v14 = vand.u32 2147483648, %v61_v9  ;;  %vm73_vm3 = vcmp.eq.f32.partialorder %v61_v9, 0.0 }
  0x38   :  { %v111_v10 = vpop.eup %110 }
  0x39   :  { %v113_v12 = vpop.eup %112  ;;  %v63_v13 = vmul.f32 %v111_v10, %v60_v8 }
  0x3a   :  { %v70_v15 = vmul.f32 %v113_v12, %v61_v9 }
  0x3b   :  { %v65_v16 = vsel %vm64_vm0, %v60_v8, %v63_v13 }
  0x3c   :  { %v68_v17 = vsel %vm66_vm1, %v67_v11, %v65_v16  ;;  %v72_v18 = vsel %vm71_vm2, %v61_v9, %v70_v15 }
  0x3d   :  { %v75_v19 = vsel %vm73_vm3, %v74_v14, %v72_v18 }
  0x3e   :  { %v76_v20 = vadd.f32 %v75_v19, %v68_v17 }
  0x40   :  { %81 = vst [vmem:[#allocation7] sm:$0xff] %v76_v20 }
  0x41   :  { %169 = shalt.err (!%p166_p6)
}
  0x42   :  { %s170_s10 = scalar_lea.hbm %s244_s2, 128 }
  0x43   :  { %p171_p7 = scmp.ne.s32.totalorder %s244_s2, %s170_s10  ;;  %p174_p8 = scmp.lt.u32.totalorder %s170_s10, %s244_s2 }
  0x45   :  { %p176_p9 = pnand %p174_p8, %p171_p7 }
  0x47   :  { %179 = shalt.err (!%p176_p9)
}
  0x48   :  { %98 = dma.vmem_to_hbm [thread:$0]  %s96_s6, 128, %s244_s2, [#allocation4]  }
  0x49   :  { %184 = dma.done.wait [#allocation4], 128  }
  0x4a   :  { %185 = vsyncadd [#allocation4], 4294967168 }
  0x4b   :  { %102 = vsyncpa [#allocation3], 1 }
  0x4c   :  { %103 = vsyncpa [#allocation6], 1 }
  0x4d   :  { %104 = vsyncpa [#allocation4], 1 }

</bundles_post_ra>
